<compile_context>
chip_gen: v6e
topology: v6e:2x2x1
jax: 0.10.0
libtpu: 0.0.40
codegen_flags: <defaults>
</compile_context>

<pallas_src>
import numpy as np

import jax
import jax.numpy as jnp
from jax import lax
from jax.experimental import pallas as pl
from jax.experimental.pallas import tpu as pltpu


def _pick_tile(total, pref):
    """Largest multiple of 8 <= min(pref, total) that divides total, else total."""
    t = min(pref, total)
    t -= t % 8
    while t >= 8:
        if total % t == 0:
            return t
        t -= 8
    return total


def interp_matrix_np(in_size, out_size):
    """Row-stochastic (out, in) 1D bilinear matrix, PyTorch align_corners=False."""
    scale = in_size / out_size
    dst = np.arange(out_size, dtype=np.float64)
    src = np.maximum((dst + 0.5) * scale - 0.5, 0.0)
    i0 = np.minimum(np.floor(src).astype(np.int64), in_size - 1)
    i1 = np.minimum(i0 + 1, in_size - 1)
    lam = np.clip(src - i0, 0.0, 1.0)
    m = np.zeros((out_size, in_size), dtype=np.float32)
    rows = np.arange(out_size)
    m[rows, i0] += (1.0 - lam).astype(np.float32)
    m[rows, i1] += lam.astype(np.float32)
    return m


# ----------------------------------------------------------------------------
# Kernel A: in-kernel im2col (from parity-split inputs) + conv/ReLU/classifier
#           as two bf16 MXU matmuls; lane-dense (rows x Wo) NCHW stores.
# ----------------------------------------------------------------------------
def _make_head_kernel(tr, cin, wo, ncls):
    def kernel(x00_ref, x01_ref, x10_ref, x11_ref,
               w1b_ref, b1b_ref, w2b_ref, b2b_ref, o_ref):
        pars = (x00_ref, x01_ref, x10_ref, x11_ref)
        row0 = pl.program_id(1) * (tr * cin)
        if (tr * cin) % 8 == 0:
            row0 = pl.multiple_of(row0, 8)
        # Gather the 9 conv taps; each is a contiguous (TR*Cin, Wo) slice of a
        # parity array (rows = (output_row, channel) packed, cols lane-dense).
        segs = []
        for di in range(3):
            pi, oi = di % 2, di // 2
            for dj in range(3):
                pj, oj = dj % 2, dj // 2
                ref = pars[pi * 2 + pj]
                segs.append(ref[pl.ds(row0 + oi * cin, tr * cin),
                                pl.ds(oj, wo)])
        patches = jnp.concatenate(segs, axis=0).astype(jnp.bfloat16)  # (9*TR*Cin, Wo)
        # backbone conv (+bias, ReLU): block-diagonal big weight, bf16 x bf16 -> f32
        h = jnp.dot(w1b_ref[...], patches, preferred_element_type=jnp.float32)
        h = jnp.maximum(h + b1b_ref[...], 0.0).astype(jnp.bfloat16)   # (TR*hidden, Wo)
        # classifier 1x1 conv: bf16 x bf16 -> f32
        out = jnp.dot(w2b_ref[...], h, preferred_element_type=jnp.float32)
        out = out + b2b_ref[...]                                      # (ncls*TR, Wo)
        for k in range(ncls):
            o_ref[k, :, :] = out[k * tr:(k + 1) * tr, :].astype(o_ref.dtype)
    return kernel


def fused_backbone_classifier(x, w1, b1, w2, b2):
    n, cin, h, w = x.shape
    assert h % 2 == 0 and w % 2 == 0, "toy backbone assumes even H/W"
    ho, wo = h // 2, w // 2
    hidden = w1.shape[0]
    ncls = w2.shape[0]
    tr = _pick_tile(ho, 8)          # output-row tile per grid step

    # pad=1 + even/odd parity split of rows and cols (XLA; ~1x input traffic
    # instead of the 9x-expanded im2col HBM round trip).
    xp = jnp.pad(x, ((0, 0), (0, 0), (1, 1), (1, 1)))

    def parity(pi, pj):
        sub = xp[:, :, pi::2, pj::2]                       # (N, Cin, Ho+1, Wo+1)
        return sub.transpose(0, 2, 1, 3).reshape(n, (ho + 1) * cin, wo + 1)

    x00, x01, x10, x11 = parity(0, 0), parity(0, 1), parity(1, 0), parity(1, 1)

    # Block-diagonal "big" weights: the whole TR-row tile becomes two matmuls.
    eye = jnp.eye(tr, dtype=jnp.float32)
    w1_r = w1.transpose(2, 3, 1, 0).reshape(9, cin, hidden)            # [t, c, o]
    w1b = jnp.einsum('yz,tco->yotzc', eye, w1_r)
    w1b = w1b.reshape(tr * hidden, 9 * tr * cin).astype(jnp.bfloat16)
    w2_2d = w2.reshape(ncls, hidden)
    w2b = jnp.einsum('yz,ko->kyzo', eye, w2_2d)
    w2b = w2b.reshape(ncls * tr, tr * hidden).astype(jnp.bfloat16)
    b1b = jnp.tile(b1, tr).reshape(tr * hidden, 1).astype(jnp.float32)
    b2b = jnp.repeat(b2, tr).reshape(ncls * tr, 1).astype(jnp.float32)

    par_spec = pl.BlockSpec((None, (ho + 1) * cin, wo + 1), lambda b, r: (b, 0, 0))
    logits = pl.pallas_call(
        _make_head_kernel(tr, cin, wo, ncls),
        out_shape=jax.ShapeDtypeStruct((n, ncls, ho, wo), jnp.float32),
        grid_spec=pltpu.PrefetchScalarGridSpec(
            num_scalar_prefetch=0,
            grid=(n, ho // tr),
            in_specs=[
                par_spec, par_spec, par_spec, par_spec,                  # parity inputs (per-batch resident)
                pl.BlockSpec((tr * hidden, 9 * tr * cin), lambda b, r: (0, 0)),
                pl.BlockSpec((tr * hidden, 1), lambda b, r: (0, 0)),
                pl.BlockSpec((ncls * tr, tr * hidden), lambda b, r: (0, 0)),
                pl.BlockSpec((ncls * tr, 1), lambda b, r: (0, 0)),
            ],
            out_specs=pl.BlockSpec((None, ncls, tr, wo), lambda b, r: (b, 0, r, 0)),
        ),
        compiler_params=pltpu.CompilerParams(
            dimension_semantics=("parallel", "parallel"),
            vmem_limit_bytes=32 * 1024 * 1024),
    )(x00, x01, x10, x11, w1b, b1b, w2b, b2b)
    return logits, ho, wo


# ----------------------------------------------------------------------------
# Kernel B: separable bilinear upsample, H-tiled; the (Ho, W) column-resampled
# intermediate is cached in VMEM scratch (computed once per (n, class)).
# ----------------------------------------------------------------------------
def _bilinear_kernel(x_ref, awt_ref, ah_ref, o_ref, t_ref):
    @pl.when(pl.program_id(2) == 0)
    def _():
        t = jnp.dot(x_ref[...].astype(jnp.bfloat16), awt_ref[...],
                    preferred_element_type=jnp.float32)           # (Ho, W)
        t_ref[...] = t.astype(jnp.bfloat16)
    o_ref[...] = jnp.dot(ah_ref[...], t_ref[...],
                         preferred_element_type=jnp.float32).astype(o_ref.dtype)


def bilinear_resample(logits, h, w):
    n, ncls, ho, wo = logits.shape
    th = _pick_tile(h, 256)
    ah = jnp.asarray(interp_matrix_np(ho, h)).astype(jnp.bfloat16)       # (H, Ho)
    awt = jnp.asarray(interp_matrix_np(wo, w).T).astype(jnp.bfloat16)    # (Wo, W)
    return pl.pallas_call(
        _bilinear_kernel,
        out_shape=jax.ShapeDtypeStruct((n, ncls, h, w), jnp.float32),
        grid_spec=pltpu.PrefetchScalarGridSpec(
            num_scalar_prefetch=0,
            grid=(n, ncls, h // th),
            in_specs=[
                pl.BlockSpec((None, None, ho, wo), lambda b, c, r: (b, c, 0, 0)),
                pl.BlockSpec((wo, w), lambda b, c, r: (0, 0)),    # Aw^T (pinned)
                pl.BlockSpec((th, ho), lambda b, c, r: (r, 0)),   # Ah row tile
            ],
            out_specs=pl.BlockSpec((None, None, th, w), lambda b, c, r: (b, c, r, 0)),
            scratch_shapes=[pltpu.VMEM((ho, w), jnp.bfloat16)],
        ),
        compiler_params=pltpu.CompilerParams(
            dimension_semantics=("parallel", "parallel", "arbitrary"),
            vmem_limit_bytes=32 * 1024 * 1024),
    )(logits, awt, ah)


# ----------------------------------------------------------------------------
# _SegmentationModel.forward
# ----------------------------------------------------------------------------
def segmentation_forward(x, params):
    n, cin, h, w = x.shape
    logits, _, _ = fused_backbone_classifier(
        x, params["w1"], params["b1"], params["w2"], params["b2"])
    return bilinear_resample(logits, h, w)                       # (N, ncls, H, W)


# ----------------------------------------------------------------------------
# Plain-JAX reference (correctness sanity check only)
# ----------------------------------------------------------------------------
def reference_forward(x, params):
    w1, b1, w2, b2 = params["w1"], params["b1"], params["w2"], params["b2"]
    n, cin, h, w = x.shape
    y = lax.conv_general_dilated(
        x, w1, window_strides=(2, 2), padding=((1, 1), (1, 1)),
        dimension_numbers=("NCHW", "OIHW", "NCHW"))
    y = jnp.maximum(y + b1[None, :, None, None], 0.0)
    y = jnp.einsum("nchw,oc->nohw", y, w2.reshape(w2.shape[0], w2.shape[1]))
    y = y + b2[None, :, None, None]
    ho, wo = y.shape[-2:]
    ah = jnp.asarray(interp_matrix_np(ho, h))
    aw = jnp.asarray(interp_matrix_np(wo, w))
    return jnp.einsum("oh,nchw,pw->ncop", ah, y, aw)


if __name__ == "__main__":
    key = jax.random.PRNGKey(0)
    k_x, k_w1, k_b1, k_w2, k_b2 = jax.random.split(key, 5)

    N, Cin, H, W = 2, 3, 16, 16
    hidden, num_classes = 16, 4

    x = jax.random.normal(k_x, (N, Cin, H, W), jnp.float32)
    params = {
        "w1": 0.1 * jax.random.normal(k_w1, (hidden, Cin, 3, 3), jnp.float32),
        "b1": 0.1 * jax.random.normal(k_b1, (hidden,), jnp.float32),
        "w2": 0.1 * jax.random.normal(k_w2, (num_classes, hidden, 1, 1), jnp.float32),
        "b2": 0.1 * jax.random.normal(k_b2, (num_classes,), jnp.float32),
    }

    fwd = jax.jit(segmentation_forward)
    out = jax.block_until_ready(fwd(x, params))

    ref = jax.block_until_ready(reference_forward(x, params))
    assert out.shape == (N, num_classes, H, W)
    # bf16 MXU inputs with f32 accumulation throughout -> relaxed tolerance.
    assert jnp.allclose(out, ref, atol=3e-2, rtol=3e-2), "mismatch vs reference"

    print("KERNEL_OK")
</pallas_src>

<mosaic_0001>
module attributes {stable_mosaic.version = 11 : i64} {
  func.func @_bilinear_kernel(%arg0: i32, %arg1: i32, %arg2: i32, %arg3: memref<1x1x8x8xf32, #tpu.memory_space<vmem>>, %arg4: memref<8x16xbf16, #tpu.memory_space<vmem>>, %arg5: memref<16x8xbf16, #tpu.memory_space<vmem>>, %arg6: memref<1x1x16x16xf32, #tpu.memory_space<vmem>>, %arg7: memref<8x16xbf16, #tpu.memory_space<vmem>>) attributes {dimension_semantics = [#tpu.dimension_semantics<parallel>, #tpu.dimension_semantics<parallel>, #tpu.dimension_semantics<arbitrary>], iteration_bounds = array<i64: 2, 4, 1>, scalar_prefetch = 0 : i64, scratch_operands = 1 : i64, tpu.core_type = #tpu.core_type<tc>, window_params = [{transform_indices = @transform_0, window_bounds = array<i64: 1, 1, 8, 8>}, {pipeline_mode = #tpu.pipeline_mode<synchronous>, transform_indices = @transform_1, window_bounds = array<i64: 8, 16>}, {transform_indices = @transform_2, window_bounds = array<i64: 16, 8>}, {transform_indices = @transform_3, window_bounds = array<i64: 1, 1, 16, 16>}]} {
    %c0_i32 = arith.constant 0 : i32
    %0 = arith.cmpi eq, %arg2, %c0_i32 : i32
    %1 = arith.extui %0 : i1 to i32
    %c0_i32_0 = arith.constant 0 : i32
    %2 = arith.cmpi ne, %1, %c0_i32_0 : i32
    scf.if %2 {
      %c0_8 = arith.constant 0 : index
      %c0_9 = arith.constant 0 : index
      %c0_10 = arith.constant 0 : index
      %c0_11 = arith.constant 0 : index
      %9 = vector.load %arg3[%c0_8, %c0_9, %c0_10, %c0_11] : memref<1x1x8x8xf32, #tpu.memory_space<vmem>>, vector<1x1x8x8xf32>
      %10 = vector.shape_cast %9 : vector<1x1x8x8xf32> to vector<8x8xf32>
      %11 = arith.truncf %10 : vector<8x8xf32> to vector<8x8xbf16>
      %c0_12 = arith.constant 0 : index
      %c0_13 = arith.constant 0 : index
      %12 = vector.load %arg4[%c0_12, %c0_13] : memref<8x16xbf16, #tpu.memory_space<vmem>>, vector<8x16xbf16>
      %cst_14 = arith.constant dense<0.000000e+00> : vector<8x16xf32>
      %13 = tpu.matmul %11, %12, %cst_14 {dimension_numbers = #tpu.dot_dimension_numbers<[1], [0], [0], [1], [0, 0, 1, 1], [], []>} : vector<8x8xbf16>, vector<8x16xbf16>, vector<8x16xf32> -> vector<8x16xf32>
      %14 = arith.truncf %13 : vector<8x16xf32> to vector<8x16xbf16>
      %c0_15 = arith.constant 0 : index
      %c0_16 = arith.constant 0 : index
      %15 = vector.load %arg7[%c0_15, %c0_16] : memref<8x16xbf16, #tpu.memory_space<vmem>>, vector<8x16xbf16>
      tpu.vector_store %arg7[%c0_15, %c0_16], %14 {strides = array<i32>} : memref<8x16xbf16, #tpu.memory_space<vmem>>, vector<8x16xbf16>,
    } else {
    }
    %c0 = arith.constant 0 : index
    %c0_1 = arith.constant 0 : index
    %3 = vector.load %arg5[%c0, %c0_1] : memref<16x8xbf16, #tpu.memory_space<vmem>>, vector<16x8xbf16>
    %c0_2 = arith.constant 0 : index
    %c0_3 = arith.constant 0 : index
    %4 = vector.load %arg7[%c0_2, %c0_3] : memref<8x16xbf16, #tpu.memory_space<vmem>>, vector<8x16xbf16>
    %cst = arith.constant dense<0.000000e+00> : vector<16x16xf32>
    %5 = tpu.matmul %3, %4, %cst {dimension_numbers = #tpu.dot_dimension_numbers<[1], [0], [0], [1], [0, 0, 1, 1], [], []>} : vector<16x8xbf16>, vector<8x16xbf16>, vector<16x16xf32> -> vector<16x16xf32>
    %c0_4 = arith.constant 0 : index
    %c0_5 = arith.constant 0 : index
    %c0_6 = arith.constant 0 : index
    %c0_7 = arith.constant 0 : index
    %6 = vector.load %arg6[%c0_4, %c0_5, %c0_6, %c0_7] : memref<1x1x16x16xf32, #tpu.memory_space<vmem>>, vector<1x1x16x16xf32>
    %7 = vector.shape_cast %6 : vector<1x1x16x16xf32> to vector<16x16xf32>
    %8 = vector.shape_cast %5 : vector<16x16xf32> to vector<1x1x16x16xf32>
    tpu.vector_store %arg6[%c0_4, %c0_5, %c0_6, %c0_7], %8 {strides = array<i32>} : memref<1x1x16x16xf32, #tpu.memory_space<vmem>>, vector<1x1x16x16xf32>,
    return
  }
  func.func @transform_0(%arg0: i32, %arg1: i32, %arg2: i32) -> (i32, i32, i32, i32) {
    %c0_i32 = arith.constant 0 : i32
    %c0_i32_0 = arith.constant 0 : i32
    %c0_i32_1 = arith.constant 0 : i32
    return %arg0, %arg1, %c0_i32, %c0_i32_0 : i32, i32, i32, i32
  }
  func.func @transform_1(%arg0: i32, %arg1: i32, %arg2: i32) -> (i32, i32) {
    %c0_i32 = arith.constant 0 : i32
    %c0_i32_0 = arith.constant 0 : i32
    %c0_i32_1 = arith.constant 0 : i32
    return %c0_i32, %c0_i32_0 : i32, i32
  }
  func.func @transform_2(%arg0: i32, %arg1: i32, %arg2: i32) -> (i32, i32) {
    %c0_i32 = arith.constant 0 : i32
    %c0_i32_0 = arith.constant 0 : i32
    return %arg2, %c0_i32 : i32, i32
  }
  func.func @transform_3(%arg0: i32, %arg1: i32, %arg2: i32) -> (i32, i32, i32, i32) {
    %c0_i32 = arith.constant 0 : i32
    %c0_i32_0 = arith.constant 0 : i32
    return %arg0, %arg1, %arg2, %c0_i32 : i32, i32, i32, i32
  }
}

module attributes {stable_mosaic.version = 11 : i64} {
  func.func @kernel(%arg0: i32, %arg1: i32, %arg2: memref<1x27x9xf32, #tpu.memory_space<vmem>>, %arg3: memref<1x27x9xf32, #tpu.memory_space<vmem>>, %arg4: memref<1x27x9xf32, #tpu.memory_space<vmem>>, %arg5: memref<1x27x9xf32, #tpu.memory_space<vmem>>, %arg6: memref<128x216xbf16, #tpu.memory_space<vmem>>, %arg7: memref<128x1xf32, #tpu.memory_space<vmem>>, %arg8: memref<32x128xbf16, #tpu.memory_space<vmem>>, %arg9: memref<32x1xf32, #tpu.memory_space<vmem>>, %arg10: memref<1x4x8x8xf32, #tpu.memory_space<vmem>>) attributes {dimension_semantics = [#tpu.dimension_semantics<parallel>, #tpu.dimension_semantics<parallel>], iteration_bounds = array<i64: 2, 1>, scalar_prefetch = 0 : i64, scratch_operands = 0 : i64, tpu.core_type = #tpu.core_type<tc>, window_params = [{transform_indices = @transform_0, window_bounds = array<i64: 1, 27, 9>}, {transform_indices = @transform_1, window_bounds = array<i64: 1, 27, 9>}, {transform_indices = @transform_2, window_bounds = array<i64: 1, 27, 9>}, {transform_indices = @transform_3, window_bounds = array<i64: 1, 27, 9>}, {pipeline_mode = #tpu.pipeline_mode<synchronous>, transform_indices = @transform_4, window_bounds = array<i64: 128, 216>}, {pipeline_mode = #tpu.pipeline_mode<synchronous>, transform_indices = @transform_5, window_bounds = array<i64: 128, 1>}, {pipeline_mode = #tpu.pipeline_mode<synchronous>, transform_indices = @transform_6, window_bounds = array<i64: 32, 128>}, {pipeline_mode = #tpu.pipeline_mode<synchronous>, transform_indices = @transform_7, window_bounds = array<i64: 32, 1>}, {transform_indices = @transform_8, window_bounds = array<i64: 1, 4, 8, 8>}]} {
    %c24_i32 = arith.constant 24 : i32
    %0 = arith.muli %arg1, %c24_i32 : i32
    %1 = tpu.assume_multiple %0, 8 : i32
    %c0_i32 = arith.constant 0 : i32
    %2 = arith.addi %1, %c0_i32 : i32
    %c0 = arith.constant 0 : index
    %3 = arith.index_cast %2 : i32 to index
    %c0_0 = arith.constant 0 : index
    %4 = vector.load %arg2[%c0, %3, %c0_0] : memref<1x27x9xf32, #tpu.memory_space<vmem>>, vector<1x24x8xf32>
    %5 = vector.shape_cast %4 : vector<1x24x8xf32> to vector<24x8xf32>
    %c0_i32_1 = arith.constant 0 : i32
    %6 = arith.addi %1, %c0_i32_1 : i32
    %c0_2 = arith.constant 0 : index
    %7 = arith.index_cast %6 : i32 to index
    %c0_3 = arith.constant 0 : index
    %8 = vector.load %arg3[%c0_2, %7, %c0_3] : memref<1x27x9xf32, #tpu.memory_space<vmem>>, vector<1x24x8xf32>
    %9 = vector.shape_cast %8 : vector<1x24x8xf32> to vector<24x8xf32>
    %c0_i32_4 = arith.constant 0 : i32
    %10 = arith.addi %1, %c0_i32_4 : i32
    %c0_5 = arith.constant 0 : index
    %11 = arith.index_cast %10 : i32 to index
    %c1 = arith.constant 1 : index
    %12 = vector.load %arg2[%c0_5, %11, %c1] : memref<1x27x9xf32, #tpu.memory_space<vmem>>, vector<1x24x8xf32>
    %13 = vector.shape_cast %12 : vector<1x24x8xf32> to vector<24x8xf32>
    %c0_i32_6 = arith.constant 0 : i32
    %14 = arith.addi %1, %c0_i32_6 : i32
    %c0_7 = arith.constant 0 : index
    %15 = arith.index_cast %14 : i32 to index
    %c0_8 = arith.constant 0 : index
    %16 = vector.load %arg4[%c0_7, %15, %c0_8] : memref<1x27x9xf32, #tpu.memory_space<vmem>>, vector<1x24x8xf32>
    %17 = vector.shape_cast %16 : vector<1x24x8xf32> to vector<24x8xf32>
    %c0_i32_9 = arith.constant 0 : i32
    %18 = arith.addi %1, %c0_i32_9 : i32
    %c0_10 = arith.constant 0 : index
    %19 = arith.index_cast %18 : i32 to index
    %c0_11 = arith.constant 0 : index
    %20 = vector.load %arg5[%c0_10, %19, %c0_11] : memref<1x27x9xf32, #tpu.memory_space<vmem>>, vector<1x24x8xf32>
    %21 = vector.shape_cast %20 : vector<1x24x8xf32> to vector<24x8xf32>
    %c0_i32_12 = arith.constant 0 : i32
    %22 = arith.addi %1, %c0_i32_12 : i32
    %c0_13 = arith.constant 0 : index
    %23 = arith.index_cast %22 : i32 to index
    %c1_14 = arith.constant 1 : index
    %24 = vector.load %arg4[%c0_13, %23, %c1_14] : memref<1x27x9xf32, #tpu.memory_space<vmem>>, vector<1x24x8xf32>
    %25 = vector.shape_cast %24 : vector<1x24x8xf32> to vector<24x8xf32>
    %c3_i32 = arith.constant 3 : i32
    %26 = arith.addi %1, %c3_i32 : i32
    %c0_15 = arith.constant 0 : index
    %27 = arith.index_cast %26 : i32 to index
    %c0_16 = arith.constant 0 : index
    %28 = vector.load %arg2[%c0_15, %27, %c0_16] : memref<1x27x9xf32, #tpu.memory_space<vmem>>, vector<1x24x8xf32>
    %29 = vector.shape_cast %28 : vector<1x24x8xf32> to vector<24x8xf32>
    %c3_i32_17 = arith.constant 3 : i32
    %30 = arith.addi %1, %c3_i32_17 : i32
    %c0_18 = arith.constant 0 : index
    %31 = arith.index_cast %30 : i32 to index
    %c0_19 = arith.constant 0 : index
    %32 = vector.load %arg3[%c0_18, %31, %c0_19] : memref<1x27x9xf32, #tpu.memory_space<vmem>>, vector<1x24x8xf32>
    %33 = vector.shape_cast %32 : vector<1x24x8xf32> to vector<24x8xf32>
    %c3_i32_20 = arith.constant 3 : i32
    %34 = arith.addi %1, %c3_i32_20 : i32
    %c0_21 = arith.constant 0 : index
    %35 = arith.index_cast %34 : i32 to index
    %c1_22 = arith.constant 1 : index
    %36 = vector.load %arg2[%c0_21, %35, %c1_22] : memref<1x27x9xf32, #tpu.memory_space<vmem>>, vector<1x24x8xf32>
    %37 = vector.shape_cast %36 : vector<1x24x8xf32> to vector<24x8xf32>
    %38 = tpu.concatenate %5, %9, %13, %17, %21, %25, %29, %33, %37 in 0 : vector<24x8xf32>, vector<24x8xf32>, vector<24x8xf32>, vector<24x8xf32>, vector<24x8xf32>, vector<24x8xf32>, vector<24x8xf32>, vector<24x8xf32>, vector<24x8xf32> -> vector<216x8xf32>
    %39 = arith.truncf %38 : vector<216x8xf32> to vector<216x8xbf16>
    %c0_23 = arith.constant 0 : index
    %c0_24 = arith.constant 0 : index
    %40 = vector.load %arg6[%c0_23, %c0_24] : memref<128x216xbf16, #tpu.memory_space<vmem>>, vector<128x216xbf16>
    %cst = arith.constant dense<0.000000e+00> : vector<128x8xf32>
    %41 = tpu.matmul %40, %39, %cst {dimension_numbers = #tpu.dot_dimension_numbers<[1], [0], [0], [1], [0, 0, 1, 1], [], []>} : vector<128x216xbf16>, vector<216x8xbf16>, vector<128x8xf32> -> vector<128x8xf32>
    %c0_25 = arith.constant 0 : index
    %c0_26 = arith.constant 0 : index
    %42 = vector.load %arg7[%c0_25, %c0_26] : memref<128x1xf32, #tpu.memory_space<vmem>>, vector<128x1xf32>
    %43 = vector.broadcast %42 : vector<128x1xf32> to vector<128x8xf32>
    %44 = arith.addf %41, %43 : vector<128x8xf32>
    %cst_27 = arith.constant 0.000000e+00 : f32
    %45 = vector.broadcast %cst_27 : f32 to vector<128x8xf32>
    %46 = arith.maximumf %44, %45 : vector<128x8xf32>
    %47 = arith.truncf %46 : vector<128x8xf32> to vector<128x8xbf16>
    %c0_28 = arith.constant 0 : index
    %c0_29 = arith.constant 0 : index
    %48 = vector.load %arg8[%c0_28, %c0_29] : memref<32x128xbf16, #tpu.memory_space<vmem>>, vector<32x128xbf16>
    %cst_30 = arith.constant dense<0.000000e+00> : vector<32x8xf32>
    %49 = tpu.matmul %48, %47, %cst_30 {dimension_numbers = #tpu.dot_dimension_numbers<[1], [0], [0], [1], [0, 0, 1, 1], [], []>} : vector<32x128xbf16>, vector<128x8xbf16>, vector<32x8xf32> -> vector<32x8xf32>
    %c0_31 = arith.constant 0 : index
    %c0_32 = arith.constant 0 : index
    %50 = vector.load %arg9[%c0_31, %c0_32] : memref<32x1xf32, #tpu.memory_space<vmem>>, vector<32x1xf32>
    %51 = vector.broadcast %50 : vector<32x1xf32> to vector<32x8xf32>
    %52 = arith.addf %49, %51 : vector<32x8xf32>
    %53 = vector.extract_strided_slice %52 {offsets = [0, 0], sizes = [8, 8], strides = [1, 1]} : vector<32x8xf32> to vector<8x8xf32>
    %c0_33 = arith.constant 0 : index
    %c0_34 = arith.constant 0 : index
    %c0_35 = arith.constant 0 : index
    %c0_36 = arith.constant 0 : index
    %54 = vector.load %arg10[%c0_33, %c0_34, %c0_35, %c0_36] : memref<1x4x8x8xf32, #tpu.memory_space<vmem>>, vector<1x1x8x8xf32>
    %55 = vector.shape_cast %54 : vector<1x1x8x8xf32> to vector<8x8xf32>
    %56 = vector.shape_cast %53 : vector<8x8xf32> to vector<1x1x8x8xf32>
    tpu.vector_store %arg10[%c0_33, %c0_34, %c0_35, %c0_36], %56 {strides = array<i32>} : memref<1x4x8x8xf32, #tpu.memory_space<vmem>>, vector<1x1x8x8xf32>,
    %57 = vector.extract_strided_slice %52 {offsets = [8, 0], sizes = [8, 8], strides = [1, 1]} : vector<32x8xf32> to vector<8x8xf32>
    %c0_37 = arith.constant 0 : index
    %c1_38 = arith.constant 1 : index
    %c0_39 = arith.constant 0 : index
    %c0_40 = arith.constant 0 : index
    %58 = vector.load %arg10[%c0_37, %c1_38, %c0_39, %c0_40] : memref<1x4x8x8xf32, #tpu.memory_space<vmem>>, vector<1x1x8x8xf32>
    %59 = vector.shape_cast %58 : vector<1x1x8x8xf32> to vector<8x8xf32>
    %60 = vector.shape_cast %57 : vector<8x8xf32> to vector<1x1x8x8xf32>
    tpu.vector_store %arg10[%c0_37, %c1_38, %c0_39, %c0_40], %60 {strides = array<i32>} : memref<1x4x8x8xf32, #tpu.memory_space<vmem>>, vector<1x1x8x8xf32>,
    %61 = vector.extract_strided_slice %52 {offsets = [16, 0], sizes = [8, 8], strides = [1, 1]} : vector<32x8xf32> to vector<8x8xf32>
    %c0_41 = arith.constant 0 : index
    %c2 = arith.constant 2 : index
    %c0_42 = arith.constant 0 : index
    %c0_43 = arith.constant 0 : index
    %62 = vector.load %arg10[%c0_41, %c2, %c0_42, %c0_43] : memref<1x4x8x8xf32, #tpu.memory_space<vmem>>, vector<1x1x8x8xf32>
    %63 = vector.shape_cast %62 : vector<1x1x8x8xf32> to vector<8x8xf32>
    %64 = vector.shape_cast %61 : vector<8x8xf32> to vector<1x1x8x8xf32>
    tpu.vector_store %arg10[%c0_41, %c2, %c0_42, %c0_43], %64 {strides = array<i32>} : memref<1x4x8x8xf32, #tpu.memory_space<vmem>>, vector<1x1x8x8xf32>,
    %65 = vector.extract_strided_slice %52 {offsets = [24, 0], sizes = [8, 8], strides = [1, 1]} : vector<32x8xf32> to vector<8x8xf32>
    %c0_44 = arith.constant 0 : index
    %c3 = arith.constant 3 : index
    %c0_45 = arith.constant 0 : index
    %c0_46 = arith.constant 0 : index
    %66 = vector.load %arg10[%c0_44, %c3, %c0_45, %c0_46] : memref<1x4x8x8xf32, #tpu.memory_space<vmem>>, vector<1x1x8x8xf32>
    %67 = vector.shape_cast %66 : vector<1x1x8x8xf32> to vector<8x8xf32>
    %68 = vector.shape_cast %65 : vector<8x8xf32> to vector<1x1x8x8xf32>
    tpu.vector_store %arg10[%c0_44, %c3, %c0_45, %c0_46], %68 {strides = array<i32>} : memref<1x4x8x8xf32, #tpu.memory_space<vmem>>, vector<1x1x8x8xf32>,
    return
  }
  func.func @transform_0(%arg0: i32, %arg1: i32) -> (i32, i32, i32) {
    %c0_i32 = arith.constant 0 : i32
    %c0_i32_0 = arith.constant 0 : i32
    %c0_i32_1 = arith.constant 0 : i32
    return %arg0, %c0_i32, %c0_i32_0 : i32, i32, i32
  }
  func.func @transform_1(%arg0: i32, %arg1: i32) -> (i32, i32, i32) {
    %c0_i32 = arith.constant 0 : i32
    %c0_i32_0 = arith.constant 0 : i32
    %c0_i32_1 = arith.constant 0 : i32
    return %arg0, %c0_i32, %c0_i32_0 : i32, i32, i32
  }
  func.func @transform_2(%arg0: i32, %arg1: i32) -> (i32, i32, i32) {
    %c0_i32 = arith.constant 0 : i32
    %c0_i32_0 = arith.constant 0 : i32
    %c0_i32_1 = arith.constant 0 : i32
    return %arg0, %c0_i32, %c0_i32_0 : i32, i32, i32
  }
  func.func @transform_3(%arg0: i32, %arg1: i32) -> (i32, i32, i32) {
    %c0_i32 = arith.constant 0 : i32
    %c0_i32_0 = arith.constant 0 : i32
    %c0_i32_1 = arith.constant 0 : i32
    return %arg0, %c0_i32, %c0_i32_0 : i32, i32, i32
  }
  func.func @transform_4(%arg0: i32, %arg1: i32) -> (i32, i32) {
    %c0_i32 = arith.constant 0 : i32
    %c0_i32_0 = arith.constant 0 : i32
    %c0_i32_1 = arith.constant 0 : i32
    return %c0_i32, %c0_i32_0 : i32, i32
  }
  func.func @transform_5(%arg0: i32, %arg1: i32) -> (i32, i32) {
    %c0_i32 = arith.constant 0 : i32
    %c0_i32_0 = arith.constant 0 : i32
    %c0_i32_1 = arith.constant 0 : i32
    return %c0_i32, %c0_i32_0 : i32, i32
  }
  func.func @transform_6(%arg0: i32, %arg1: i32) -> (i32, i32) {
    %c0_i32 = arith.constant 0 : i32
    %c0_i32_0 = arith.constant 0 : i32
    %c0_i32_1 = arith.constant 0 : i32
    return %c0_i32, %c0_i32_0 : i32, i32
  }
  func.func @transform_7(%arg0: i32, %arg1: i32) -> (i32, i32) {
    %c0_i32 = arith.constant 0 : i32
    %c0_i32_0 = arith.constant 0 : i32
    %c0_i32_1 = arith.constant 0 : i32
    return %c0_i32, %c0_i32_0 : i32, i32
  }
  func.func @transform_8(%arg0: i32, %arg1: i32) -> (i32, i32, i32, i32) {
    %c0_i32 = arith.constant 0 : i32
    %c0_i32_0 = arith.constant 0 : i32
    %c0_i32_1 = arith.constant 0 : i32
    return %arg0, %c0_i32, %arg1, %c0_i32_0 : i32, i32, i32, i32
  }
}

</mosaic_0001>

<bundles_post_ra>
// kernel: tile.8
= control target key start
LH: loop header
LB: loop body
LE: loop exit
PB: predicated region body
PF: predicated region fallthrough
CT: control target
= control target key end

     0   :  { %s22_s0 = inlined_call_operand.vmem [shape: f32[16], index: 0, kind: input, shape index: {}]   ;;  %s23_s1 = inlined_call_operand.vmem [shape: f32[8,16], index: 1, kind: output, shape index: {}]  }
   0x1   :  { %v4_v0 = vld [vmem:[%s22_s0] ss:$0 sm:$0xff] }
   0x2   :  { %5 = vst [vmem:[%s23_s1] sm:$0xff] %v4_v0 }

// kernel: tile.0
= control target key start
LH: loop header
LB: loop body
LE: loop exit
PB: predicated region body
PF: predicated region fallthrough
CT: control target
= control target key end

     0   :  { %vm3_vm0 = vcmask 7168   ;;  %s264_s8 = smov 125   ;;  %s265_s17 = smov 126   ;;  %s547_s0 = inlined_call_operand.vmem [shape: f32[8,16], index: 0, kind: input, shape index: {}]   ;;  %s548_s1 = inlined_call_operand.vmem [shape: f32[128,1], index: 1, kind: output, shape index: {}]  }
   0x1   :  { %v8_v0 = vld [vmem:[%s547_s0] sm:$0xff]   ;;  %s263_s0 = smov 127   ;;  %s266_s18 = smov 124  }
   0x2   :  { %9 = vrot.lane.b32.xlu0 %v8_v0, %s263_s0  ;;  %33 = vrot.lane.b32.xlu1 %v8_v0, %s264_s8  ;;  %4 = vst.msk [vmem:[%s548_s1] ss:$16 sm:$0x3] %vm3_vm0, %v8_v0   ;;  %5 = vst.msk [vmem:[%s548_s1] ss:$16 sm:$0xc] %vm3_vm0, %v8_v0  }
   0x3   :  { %6 = vst.msk [vmem:[%s548_s1] ss:$16 sm:$0x30] %vm3_vm0, %v8_v0   ;;  %7 = vst.msk [vmem:[%s548_s1] ss:$16 sm:$0xc0] %vm3_vm0, %v8_v0  }
   0x4   :  { %s267_s19 = smov 123   ;;  %s268_s20 = smov 122  }
   0x5   :  { %s269_s21 = smov 121   ;;  %s270_s22 = smov 120  }
   0x6   :  { %21 = vrot.lane.b32.xlu0 %v8_v0, %s265_s17  ;;  %45 = vrot.lane.b32.xlu1 %v8_v0, %s266_s18  ;;  %s271_s23 = smov 119   ;;  %s272_s24 = smov 118  }
   0x7   :  { %s273_s25 = smov 117   ;;  %s274_s26 = smov 116  }
   0x8   :  { %s275_s27 = smov 115   ;;  %s276_s28 = smov 114  }
   0x9   :  { %s277_s29 = smov 113  }
   0xa   :  { %57 = vrot.lane.b32.xlu0 %v8_v0, %s267_s19  ;;  %69 = vrot.lane.b32.xlu1 %v8_v0, %s268_s20 }
   0xe   :  { %81 = vrot.lane.b32.xlu0 %v8_v0, %s269_s21  ;;  %93 = vrot.lane.b32.xlu1 %v8_v0, %s270_s22 }
  0x12   :  { %105 = vrot.lane.b32.xlu0 %v8_v0, %s271_s23  ;;  %117 = vrot.lane.b32.xlu1 %v8_v0, %s272_s24 }
  0x16   :  { %129 = vrot.lane.b32.xlu0 %v8_v0, %s273_s25  ;;  %141 = vrot.lane.b32.xlu1 %v8_v0, %s274_s26 }
  0x1a   :  { %153 = vrot.lane.b32.xlu0 %v8_v0, %s275_s27  ;;  %165 = vrot.lane.b32.xlu1 %v8_v0, %s276_s28 }
  0x1e   :  { %177 = vrot.lane.b32.xlu0 %v8_v0, %s277_s29 }
  0x74   :  { %v10_v1 = vpop.permute.xlu0 %9   ;;  %v34_v2 = vpop.permute.xlu1 %33  }
  0x75   :  { %188 = vst.msk [vmem:[%s548_s1 + $0x1] ss:$16 sm:$0x3] %vm3_vm0, %v10_v1   ;;  %189 = vst.msk [vmem:[%s548_s1 + $0x1] ss:$16 sm:$0xc] %vm3_vm0, %v10_v1  }
  0x76   :  { %190 = vst.msk [vmem:[%s548_s1 + $0x1] ss:$16 sm:$0x30] %vm3_vm0, %v10_v1   ;;  %191 = vst.msk [vmem:[%s548_s1 + $0x1] ss:$16 sm:$0xc0] %vm3_vm0, %v10_v1  }
  0x77   :  { %196 = vst.msk [vmem:[%s548_s1 + $0x3] ss:$16 sm:$0x3] %vm3_vm0, %v34_v2   ;;  %197 = vst.msk [vmem:[%s548_s1 + $0x3] ss:$16 sm:$0xc] %vm3_vm0, %v34_v2  }
  0x78   :  { %198 = vst.msk [vmem:[%s548_s1 + $0x3] ss:$16 sm:$0x30] %vm3_vm0, %v34_v2   ;;  %199 = vst.msk [vmem:[%s548_s1 + $0x3] ss:$16 sm:$0xc0] %vm3_vm0, %v34_v2   ;;  %v22_v3 = vpop.permute.xlu0 %21   ;;  %v46_v4 = vpop.permute.xlu1 %45  }
  0x79   :  { %192 = vst.msk [vmem:[%s548_s1 + $0x2] ss:$16 sm:$0x3] %vm3_vm0, %v22_v3   ;;  %193 = vst.msk [vmem:[%s548_s1 + $0x2] ss:$16 sm:$0xc] %vm3_vm0, %v22_v3  }
  0x7a   :  { %194 = vst.msk [vmem:[%s548_s1 + $0x2] ss:$16 sm:$0x30] %vm3_vm0, %v22_v3   ;;  %195 = vst.msk [vmem:[%s548_s1 + $0x2] ss:$16 sm:$0xc0] %vm3_vm0, %v22_v3  }
  0x7b   :  { %200 = vst.msk [vmem:[%s548_s1 + $0x4] ss:$16 sm:$0x3] %vm3_vm0, %v46_v4   ;;  %201 = vst.msk [vmem:[%s548_s1 + $0x4] ss:$16 sm:$0xc] %vm3_vm0, %v46_v4  }
  0x7c   :  { %202 = vst.msk [vmem:[%s548_s1 + $0x4] ss:$16 sm:$0x30] %vm3_vm0, %v46_v4   ;;  %203 = vst.msk [vmem:[%s548_s1 + $0x4] ss:$16 sm:$0xc0] %vm3_vm0, %v46_v4   ;;  %v58_v5 = vpop.permute.xlu0 %57   ;;  %v70_v6 = vpop.permute.xlu1 %69  }
  0x7d   :  { %204 = vst.msk [vmem:[%s548_s1 + $0x5] ss:$16 sm:$0x3] %vm3_vm0, %v58_v5   ;;  %205 = vst.msk [vmem:[%s548_s1 + $0x5] ss:$16 sm:$0xc] %vm3_vm0, %v58_v5  }
  0x7e   :  { %206 = vst.msk [vmem:[%s548_s1 + $0x5] ss:$16 sm:$0x30] %vm3_vm0, %v58_v5   ;;  %207 = vst.msk [vmem:[%s548_s1 + $0x5] ss:$16 sm:$0xc0] %vm3_vm0, %v58_v5  }
  0x7f   :  { %208 = vst.msk [vmem:[%s548_s1 + $0x6] ss:$16 sm:$0x3] %vm3_vm0, %v70_v6   ;;  %209 = vst.msk [vmem:[%s548_s1 + $0x6] ss:$16 sm:$0xc] %vm3_vm0, %v70_v6  }
  0x80   :  { %210 = vst.msk [vmem:[%s548_s1 + $0x6] ss:$16 sm:$0x30] %vm3_vm0, %v70_v6   ;;  %211 = vst.msk [vmem:[%s548_s1 + $0x6] ss:$16 sm:$0xc0] %vm3_vm0, %v70_v6   ;;  %v82_v7 = vpop.permute.xlu0 %81   ;;  %v94_v8 = vpop.permute.xlu1 %93  }
  0x81   :  { %212 = vst.msk [vmem:[%s548_s1 + $0x7] ss:$16 sm:$0x3] %vm3_vm0, %v82_v7   ;;  %213 = vst.msk [vmem:[%s548_s1 + $0x7] ss:$16 sm:$0xc] %vm3_vm0, %v82_v7  }
  0x82   :  { %214 = vst.msk [vmem:[%s548_s1 + $0x7] ss:$16 sm:$0x30] %vm3_vm0, %v82_v7   ;;  %215 = vst.msk [vmem:[%s548_s1 + $0x7] ss:$16 sm:$0xc0] %vm3_vm0, %v82_v7  }
  0x83   :  { %216 = vst.msk [vmem:[%s548_s1 + $0x8] ss:$16 sm:$0x3] %vm3_vm0, %v94_v8   ;;  %217 = vst.msk [vmem:[%s548_s1 + $0x8] ss:$16 sm:$0xc] %vm3_vm0, %v94_v8  }
  0x84   :  { %218 = vst.msk [vmem:[%s548_s1 + $0x8] ss:$16 sm:$0x30] %vm3_vm0, %v94_v8   ;;  %219 = vst.msk [vmem:[%s548_s1 + $0x8] ss:$16 sm:$0xc0] %vm3_vm0, %v94_v8   ;;  %v106_v9 = vpop.permute.xlu0 %105   ;;  %v118_v10 = vpop.permute.xlu1 %117  }
  0x85   :  { %220 = vst.msk [vmem:[%s548_s1 + $0x9] ss:$16 sm:$0x3] %vm3_vm0, %v106_v9   ;;  %221 = vst.msk [vmem:[%s548_s1 + $0x9] ss:$16 sm:$0xc] %vm3_vm0, %v106_v9  }
  0x86   :  { %222 = vst.msk [vmem:[%s548_s1 + $0x9] ss:$16 sm:$0x30] %vm3_vm0, %v106_v9   ;;  %223 = vst.msk [vmem:[%s548_s1 + $0x9] ss:$16 sm:$0xc0] %vm3_vm0, %v106_v9  }
  0x87   :  { %224 = vst.msk [vmem:[%s548_s1 + $0xa] ss:$16 sm:$0x3] %vm3_vm0, %v118_v10   ;;  %225 = vst.msk [vmem:[%s548_s1 + $0xa] ss:$16 sm:$0xc] %vm3_vm0, %v118_v10  }
  0x88   :  { %226 = vst.msk [vmem:[%s548_s1 + $0xa] ss:$16 sm:$0x30] %vm3_vm0, %v118_v10   ;;  %227 = vst.msk [vmem:[%s548_s1 + $0xa] ss:$16 sm:$0xc0] %vm3_vm0, %v118_v10   ;;  %v130_v11 = vpop.permute.xlu0 %129   ;;  %v142_v12 = vpop.permute.xlu1 %141  }
  0x89   :  { %228 = vst.msk [vmem:[%s548_s1 + $0xb] ss:$16 sm:$0x3] %vm3_vm0, %v130_v11   ;;  %229 = vst.msk [vmem:[%s548_s1 + $0xb] ss:$16 sm:$0xc] %vm3_vm0, %v130_v11  }
  0x8a   :  { %230 = vst.msk [vmem:[%s548_s1 + $0xb] ss:$16 sm:$0x30] %vm3_vm0, %v130_v11   ;;  %231 = vst.msk [vmem:[%s548_s1 + $0xb] ss:$16 sm:$0xc0] %vm3_vm0, %v130_v11  }
  0x8b   :  { %232 = vst.msk [vmem:[%s548_s1 + $0xc] ss:$16 sm:$0x3] %vm3_vm0, %v142_v12   ;;  %233 = vst.msk [vmem:[%s548_s1 + $0xc] ss:$16 sm:$0xc] %vm3_vm0, %v142_v12  }
  0x8c   :  { %234 = vst.msk [vmem:[%s548_s1 + $0xc] ss:$16 sm:$0x30] %vm3_vm0, %v142_v12   ;;  %235 = vst.msk [vmem:[%s548_s1 + $0xc] ss:$16 sm:$0xc0] %vm3_vm0, %v142_v12   ;;  %v154_v13 = vpop.permute.xlu0 %153   ;;  %v166_v14 = vpop.permute.xlu1 %165  }
  0x8d   :  { %236 = vst.msk [vmem:[%s548_s1 + $0xd] ss:$16 sm:$0x3] %vm3_vm0, %v154_v13   ;;  %237 = vst.msk [vmem:[%s548_s1 + $0xd] ss:$16 sm:$0xc] %vm3_vm0, %v154_v13  }
  0x8e   :  { %238 = vst.msk [vmem:[%s548_s1 + $0xd] ss:$16 sm:$0x30] %vm3_vm0, %v154_v13   ;;  %239 = vst.msk [vmem:[%s548_s1 + $0xd] ss:$16 sm:$0xc0] %vm3_vm0, %v154_v13  }
  0x8f   :  { %240 = vst.msk [vmem:[%s548_s1 + $0xe] ss:$16 sm:$0x3] %vm3_vm0, %v166_v14   ;;  %241 = vst.msk [vmem:[%s548_s1 + $0xe] ss:$16 sm:$0xc] %vm3_vm0, %v166_v14  }
  0x90   :  { %242 = vst.msk [vmem:[%s548_s1 + $0xe] ss:$16 sm:$0x30] %vm3_vm0, %v166_v14   ;;  %243 = vst.msk [vmem:[%s548_s1 + $0xe] ss:$16 sm:$0xc0] %vm3_vm0, %v166_v14   ;;  %v178_v15 = vpop.permute.xlu0 %177  }
  0x91   :  { %244 = vst.msk [vmem:[%s548_s1 + $0xf] ss:$16 sm:$0x3] %vm3_vm0, %v178_v15   ;;  %245 = vst.msk [vmem:[%s548_s1 + $0xf] ss:$16 sm:$0xc] %vm3_vm0, %v178_v15  }
  0x92   :  { %246 = vst.msk [vmem:[%s548_s1 + $0xf] ss:$16 sm:$0x30] %vm3_vm0, %v178_v15   ;;  %247 = vst.msk [vmem:[%s548_s1 + $0xf] ss:$16 sm:$0xc0] %vm3_vm0, %v178_v15  }

// kernel: segmentation_forward.3
= control target key start
LH: loop header
LB: loop body
LE: loop exit
PB: predicated region body
PF: predicated region fallthrough
CT: control target
= control target key end

     0   :  { %8 = vsyncpa [#allocation4], 0  ;;  %s841_s0 = inlined_call_operand.vmem [shape: f32[2,4,8,8], index: 0, kind: input, shape index: {}]   ;;  %s842_s1 = inlined_call_operand.vmem [shape: bf16[8,16], index: 1, kind: input, shape index: {}]   ;;  %s843_s2 = inlined_call_operand.vmem [shape: bf16[16,8], index: 2, kind: input, shape index: {}]   ;;  %s844_s3 = inlined_call_operand.hbm [shape: f32[2,4,16,16], index: 3, kind: output, shape index: {}]  }
   0x1   :  { %10 = vsyncpa [#allocation4 + $0x1], 0  ;;  %s694_s12 = smov 0   ;;  %s696_s13 = smov 0  }
   0x2   :  { %s698_s14 = smov 0   ;;  %s700_s15 = smov 0  }
   0x3   :  { %s702_s16 = smov 0   ;;  %s704_s17 = smov 0  }
   0x4   :  { %s706_s18 = smov 0   ;;  %s708_s19 = smov 0  }
   0x5 LB: > { %s465_s20 = sadd.s32 4294967295, %s667_s19   ;;  %s466_s21 = sadd.s32 4294967294, %s667_s19   ;;  %s667_s19 = sphi %s708_s19, %s16_s19   ;;  %s663_s18 = sphi %s706_s18, %s853_s18   ;;  %s659_s17 = sphi %s704_s17, %s852_s17   ;;  %s655_s16 = sphi %s702_s16, %s851_s16   ;;  %s651_s15 = sphi %s700_s15, %s850_s15   ;;  %s647_s14 = sphi %s698_s14, %s849_s14   ;;  %s643_s13 = sphi %s696_s13, %s848_s13   ;;  %s639_s12 = sphi %s694_s12, %s847_s12  }
   0x6   : > { %s31_s22 = sadd.s32 1, %s659_s17  ;;  %s35_s23 = sadd.s32 1, %s663_s18 }
   0x7   : > { %p33_p0 = scmp.ge.s32.totalorder %s31_s22, 4  ;;  %p131_p1 = scmp.ne.s32.totalorder %s647_s14, %s643_s13 }
   0x8   : > { %p132_p2 = scmp.eq.s32.totalorder %s465_s20, 7  ;;  %p137_p5 = scmp.ne.s32.totalorder %s643_s13, %s639_s12 }
   0x9   : > { %s855_s22 = smov (%p33_p0, %s31_s22), 0  ;;  %s857_s23 = smov (!%p33_p0, %s35_s23), %s663_s18 }
   0xa   : > { %s115_s24 = ssub.s32 %s659_s17, %s855_s22  ;;  %p745_p3 = por %p132_p2, %p131_p1 }
   0xb   : > { %p37_p4 = scmp.ge.s32.totalorder %s857_s23, 2  ;;  %p138_p6 = scmp.eq.s32.totalorder %s466_s21, 7 }
   0xc   : > { %p470_p7 = scmp.ge.s32.totalorder %s667_s19, 1  ;;  %p179_p9 = scmp.lt.s32.totalorder %s667_s19, 9 }
   0xd   : > { %s859_s23 = smov (%p37_p4, %s857_s23), 0  ;;  %p754_p8 = por %p138_p6, %p137_p5 }
   0xe   : > { %s114_s27 = ssub.s32 %s663_s18, %s859_s23  ;;  %s121_s28 = sadd.s32 1, %s647_s14 }
   0xf   : > { %s116_s29 = sor.u32 %s115_s24, %s114_s27  ;;  %p180_p10 = pnand %p470_p7, %p179_p9 }
  0x10   : > { %p119_p11 = scmp.eq.s32.totalorder %s116_s29, 0  ;;  %p211_p12 = scmp.lt.s32.totalorder (!%p180_p10), %s655_s16, 1 }
  0x11   : > { %183 = sbr.rel (%p180_p10) target bundleno = 450 (0x1c2), region = 32  ;;  %p213_p13 = scmp.lt.s32.totalorder (!%p180_p10), %s651_s15, 3 }
  0x12   : > { %s763_s30 = scalar_select %p119_p11, %s647_s14, %s121_s28  }
  0x13   : > { %s208_s28 = sand.u32 (!%p180_p10), 1, %s643_s13   ;;  %s478_s29 = sshll.u32 (!%p180_p10), %s651_s15, 1 }
  0x14   : > { %s479_s4 = sshll.u32 (!%p180_p10), %s655_s16, 3  ;;  %s471_s5 = sshll.u32 (!%p180_p10), %s208_s28, 4 }
  0x16   : > { %v233_v0 = vld [vmem:[%s842_s1] sm:$0xf]  ;;  %vm238_vm0 = vcmask 1043456   ;;  %v669_v1 = vmov 0.0   ;;  %vm670_vm1 = vmmov 0   ;;  %s212_s6 = scalar_select %p211_p12, %s655_s16, 1 }
  0x17   : > { %487 = vmatprep.subr.bf16.mxu0 %v669_v1  ;;  %v240_v2 = vsel %vm238_vm0, %v233_v0, 0  ;;  %489 = vmatprep.mubr.msk.bf16.mxu0 %vm670_vm1, %v669_v1  ;;  %s214_s7 = scalar_select %p213_p13, %s651_s15, 3  ;;  %vm234_vm2 = vcmask 64512   ;;  %vm283_vm3 = vcmask 125952   ;;  %v574_v12 = vld [vmem:[%s843_s2] sm:$0xff]   ;;  %vm342_vm4 = vcmask 130048  }
  0x18   : > { %488 = vmatpush3.bf16.msra.mxu0 %v240_v2  ;;  %493 = vmatprep.subr.bf16.mxu1 %v669_v1  ;;  %s472_s8 = sshll.u32 %s212_s6, 2  ;;  %s360_s6 = sadd.s32 %s479_s4, %s478_s29 }
  0x19   : > { %495 = vmatprep.mubr.msk.bf16.mxu1 %vm670_vm1, %v669_v1  ;;  %s216_s9 = sadd.s32 %s472_s8, %s214_s7  ;;  %s210_s7 = scalar_lea.vmem [#allocation3], %s471_s5 }
  0x1a   : > { %s473_s10 = sshll.u32 %s216_s9, 3  ;;  %s363_s8 = sshll.u32 %s210_s7, 4  ;;  %s783_s8 = int_to_ptr.vmem [resolvable:$true] %s363_s8 }
  0x1b   : > { %s218_s21 = scalar_lea.vmem %s841_s0, %s473_s10  ;;  %s480_s9 = sshll.u32 %s360_s6, 7 }
  0x1c   : > { %v231_v3 = vld [vmem:[%s218_s21] sm:$0xff]  ;;  %s788_s15 = scalar_lea.hbm %s844_s3, %s480_s9  ;;  %s790_s16 = scalar_lea.sflag [#allocation4], %s208_s28 }
  0x1d   : > { %v232_v4 = vpack.c.bf16 %v231_v3, %v231_v3  ;;  %s575_s20 = scalar_lea.vmem %s783_s8, 256  ;;  %s671_s21 = smov [#allocation3]  }
  0x1e   : > { %p576_p0 = scmp.ne.s32.totalorder %s783_s8, %s575_s20  ;;  %s579_s24 = sshll.u32 %s671_s21, 4  ;;  %s580_s24 = int_to_ptr.vmem [resolvable:$false] %s579_s24 }
  0x1f   : > { %490 = vmatmul.mubr.msk.bf16.vlgmr.msra.gmra.mxu0 %vm234_vm2, %v232_v4  ;;  %s581_s27 = scalar_lea.vmem %s580_s24, 512  ;;  %p582_p4 = scmp.lt.s32.totalorder %s783_s8, %s580_s24 }
  0x20   : > { %p577_p1 = pnand %p576_p0, %p745_p3  ;;  %p583_p5 = scmp.lt.s32.totalorder %s581_s27, %s575_s20 }
  0x22   : > { %p578_p2 = pneg %p577_p1  ;;  %p584_p6 = por %p583_p5, %p582_p4 }
  0x24   : > { %p585_p7 = pnand %p584_p6, %p578_p2 }
  0xdf   : > { %v276_v5 = vpop.f32.mrf.mxu0 }
  0xe0   : > { %v282_v6 = vpack.c.bf16 %v276_v5, %v276_v5 }
  0xe1   : > { %v491_v7 = vpop.f32.mrf.mxu0 }
  0xe2   : > { %284 = vst.msk [vmem:[#allocation2] sm:$0xf] %vm283_vm3, %v282_v6 }
  0xe3   : > { %v279_v8 = vpop.f32.mrf.mxu0 }
  0xe5   : > { %v492_v9 = vpop.f32.mrf.mxu0 }
  0xe9   : > { %v287_v10 = vld [vmem:[#allocation2] sm:$0xf] }
  0xea   : > { %v299_v11 = vsel %vm238_vm0, %v287_v10, 0 }
  0xeb   : > { %494 = vmatpush3.bf16.msra.mxu1 %v299_v11 }
  0xee   : > { %496 = vmatmul.mubr.msk.bf16.vlgmr.msra.gmra.mxu1 %vm234_vm2, %v574_v12 }
 0x1ae   : > { %v335_v13 = vpop.f32.mrf.mxu1 }
 0x1af   : > { %343 = vst.msk [vmem:[%s210_s7] sm:$0xff] %vm342_vm4, %v335_v13 }
 0x1b0   : > { %v497_v14 = vpop.f32.mrf.mxu1 }
 0x1b2   : > { %v338_v15 = vpop.f32.mrf.mxu1 }
 0x1b3   : > { %344 = vst.msk [vmem:[%s210_s7 + $0x8] sm:$0xff] %vm342_vm4, %v338_v15 }
 0x1b4   : > { %v498_v16 = vpop.f32.mrf.mxu1 }
 0x1b5   : > { %588 = shalt.err (!%p585_p7)
}
 0x1b6   : > { %s589_s28 = scalar_lea.hbm %s788_s15, 256  ;;  %s593_s5 = scalar_lea.hbm %s844_s3, 2048 }
 0x1b7   : > { %p590_p9 = scmp.ne.s32.totalorder %s788_s15, %s589_s28  ;;  %p594_p12 = scmp.lt.s32.totalorder %s788_s15, %s844_s3 }
 0x1b8   : > { %p595_p13 = scmp.lt.s32.totalorder %s593_s5, %s589_s28 }
 0x1b9   : > { %p591_p10 = pnand %p590_p9, %p745_p3 }
 0x1ba   : > { %p596_p0 = por %p595_p13, %p594_p12 }
 0x1bb   : > { %p592_p11 = pneg %p591_p10 }
 0x1bd   : > { %p597_p1 = pnand %p596_p0, %p592_p11 }
 0x1bf   : > { %600 = shalt.err (!%p597_p1)
}
 0x1c0   : > { %s672_s9 = smov 128   ;;  %s673_s10 = smov 8  }
 0x1c1   : > { %499 = dma.vmem_to_hbm [thread:$0]  (%p745_p3), %s783_s8, 256, %s788_s15, %s790_s16, %s672_s9, %s672_s9, %s673_s10  }
 0x1c2 PF: > { %p505_p2 = scmp.ge.s32.totalorder %s667_s19, 2  ;;  %s378_s11 = sand.u32 1, %s639_s12  }
 0x1c3   : > { %s379_s20 = scalar_lea.sflag [#allocation4], %s378_s11 }
 0x1c4   : > { %p502_p4 = pnand %p505_p2, %p754_p8 }
 0x1c6   : > { %p503_p5 = pneg %p502_p4 }
 0x1c8   : > { %634 = dma.done.wait (%p503_p5), %s379_s20, 256  }
 0x1c9   : > { %636 = vsyncadd (%p503_p5), %s379_s20, 4294967040  ;;  %s16_s19 = sadd.s32 1, %s667_s19   ;;  %s847_s12 = smov %s643_s13 }
 0x1ca   : > { %p13_p6 = scmp.ge.s32.totalorder %s16_s19, 10   ;;  %s848_s13 = smov %s647_s14 }
 0x1cb   : > { %s849_s14 = smov %s763_s30  ;;  %s850_s15 = smov %s659_s17 }
 0x1cc   : > { %s851_s16 = smov %s663_s18  ;;  %s852_s17 = smov %s855_s22 }
 0x1cd   : > { %s853_s18 = smov %s859_s23  ;;  %15 = sbr.rel (!%p13_p6) target bundleno = 5 (0x5), region = 74 }
 0x1d2   :  { %384 = vsyncpa [#allocation4], 1 }
 0x1d3   :  { %386 = vsyncpa [#allocation4 + $0x1], 1 }

// kernel: segmentation_forward.2
= control target key start
LH: loop header
LB: loop body
LE: loop exit
PB: predicated region body
PF: predicated region fallthrough
CT: control target
= control target key end

     0   :  { %s1248_s27 = smov 0   ;;  %s1250_s28 = smov 0   ;;  %s1514_s0 = inlined_call_operand.vmem [shape: f32[2,27,9], index: 0, kind: input, shape index: {}]   ;;  %s1515_s1 = inlined_call_operand.vmem [shape: f32[2,27,9], index: 1, kind: input, shape index: {}]   ;;  %s1516_s2 = inlined_call_operand.vmem [shape: f32[2,27,9], index: 2, kind: input, shape index: {}]   ;;  %s1517_s3 = inlined_call_operand.vmem [shape: f32[2,27,9], index: 3, kind: input, shape index: {}]   ;;  %s1518_s4 = inlined_call_operand.vmem [shape: bf16[128,216], index: 4, kind: input, shape index: {}]   ;;  %s1519_s5 = inlined_call_operand.vmem [shape: f32[128,1], index: 5, kind: input, shape index: {}]   ;;  %s1520_s6 = inlined_call_operand.vmem [shape: bf16[32,128], index: 6, kind: input, shape index: {}]   ;;  %s1521_s7 = inlined_call_operand.vmem [shape: f32[32,1], index: 7, kind: input, shape index: {}]   ;;  %s1522_s8 = inlined_call_operand.vmem [shape: f32[2,4,8,8], index: 8, kind: output, shape index: {}]  }
   0x1   :  { %s1252_s29 = smov 0  }
   0x2 LB: > { %s30_s30 = sadd.s32 1, %s1195_s28  ;;  %p1025_p0 = scmp.ge.s32.totalorder %s1199_s29, 1  ;;  %s1199_s29 = sphi %s1252_s29, %s18_s29   ;;  %s1195_s28 = sphi %s1250_s28, %s1524_s28   ;;  %s1191_s27 = sphi %s1248_s27, %s1523_s27  }
   0x3   : > { %p32_p1 = scmp.ge.s32.totalorder %s30_s30, 2  ;;  %p306_p2 = scmp.lt.s32.totalorder %s1199_s29, 3 }
   0x5   : > { %s1526_s30 = smov (%p32_p1, %s30_s30), 0  ;;  %p307_p3 = pnand %p1025_p0, %p306_p2 }
   0x6   : > { %p358_p4 = scmp.lt.s32.totalorder (!%p307_p3), %s1191_s27, 1  ;;  %s1202_s16 = smov (!%p307_p3), 127  }
   0x7   : > { %310 = sbr.rel (%p307_p3) target bundleno = 681 (0x2a9), region = 52 }
   0xc   : > { %v1201_v0 = vmov 0   ;;  %s1528_s27 = smov (!%p358_p4, %s1191_s27), 1  ;;  %v1153_v16 = vld [vmem:[%s1518_s4 + $0x4] ss:$8 sps:$4 sm:$0xff]   ;;  %vm647_vm0 = vcmask 719872   ;;  %v494_v17 = vld [vmem:[%s1519_s5 + $0x78] sm:$0xff] }
   0xd   : > { %676 = vmatprep.subr.bf16.mxu0 %v1201_v0  ;;  %1150 = vset.pattern.permute.xlu1 %v1201_v0  ;;  %s1269_s9 = sshll.u32 %s1528_s27, 5  ;;  %v493_v18 = vld [vmem:[%s1519_s5 + $0x70] sm:$0xff]  ;;  %v491_v19 = vld [vmem:[%s1519_s5 + $0x60] sm:$0xff]  ;;  %v492_v20 = vld [vmem:[%s1519_s5 + $0x68] sm:$0xff]  ;;  %vm672_vm1 = vcmask 1043456   ;;  %vm886_vm2 = vcmask 64512  }
   0xe   : > { %1149 = vset.pattern.permute.xlu0 %v1201_v0  ;;  %s372_s12 = scalar_lea.vmem %s1516_s2, %s1269_s9  ;;  %s362_s15 = scalar_lea.vmem %s1514_s0, %s1269_s9  ;;  %1058 = vmatprep.mubr.msk.bf16.mxu0 %vm647_vm0, %v1153_v16  ;;  %v489_v21 = vld [vmem:[%s1519_s5 + $0x50] sm:$0xff]  ;;  %v490_v22 = vld [vmem:[%s1519_s5 + $0x58] sm:$0xff]  ;;  %v487_v23 = vld [vmem:[%s1519_s5 + $0x40] sm:$0xff] }
   0xf   : > { %v1279_v1 = vld [vmem:[%s372_s12] sm:$0xff]  ;;  %v1284_v3 = vld [vmem:[%s362_s15 + $0x8] sm:$0xff]  ;;  %v1286_v4 = vld [vmem:[%s362_s15 + $0x10] sm:$0xff]  ;;  %s377_s11 = scalar_lea.vmem %s1517_s3, %s1269_s9  ;;  %s1391_s10 = scalar_lea.vmem %s1515_s1, %s1269_s9 }
  0x10   : > { %v1281_v2 = vld [vmem:[%s362_s15] sm:$0xff]  ;;  %428 = vrot.lane.b32.xlu0 %v1279_v1, %s1202_s16  ;;  %v1294_v8 = vld [vmem:[%s362_s15 + $0xb] sm:$0xff]  ;;  %v1303_v12 = vld [vmem:[%s362_s15 + $0x13] sm:$0xff] }
  0x11   : > { %v1134_v5 = vpack.i.bf16 %v1284_v3, %v1281_v2  ;;  %v449_v6 = vpack.c.bf16 %v1284_v3, %v1281_v2  ;;  %v1292_v7 = vld [vmem:[%s362_s15 + $0x3] sm:$0xff]  ;;  %v1298_v10 = vld [vmem:[%s372_s12 + $0x10] sm:$0xff]  ;;  %v486_v26 = vld [vmem:[%s1519_s5 + $0x38] sm:$0xff] }
  0x12   : > { %v1296_v9 = vld [vmem:[%s372_s12 + $0x8] sm:$0xff]  ;;  %v1139_v13 = vpack.i.bf16 %v1294_v8, %v1292_v7  ;;  %v458_v15 = vpack.c.bf16 %v1294_v8, %v1292_v7  ;;  %v485_v25 = vld [vmem:[%s1519_s5 + $0x30] sm:$0xff]  ;;  %v483_v27 = vld [vmem:[%s1519_s5 + $0x20] sm:$0xff] }
  0x13   : > { %1135 = vrot.lane.b32.xlu1 %v1134_v5, %s1202_s16  ;;  %v454_v11 = vpack.c.bf16 %v1298_v10, %v1296_v9  ;;  %v1144_v14 = vpack.i.bf16 %v1298_v10, %v1296_v9  ;;  %v488_v24 = vld [vmem:[%s1519_s5 + $0x48] sm:$0xff]  ;;  %v481_v29 = vld [vmem:[%s1519_s5 + $0x10] sm:$0xff]  ;;  %v482_v30 = vld [vmem:[%s1519_s5 + $0x18] sm:$0xff] }
  0x14   : > { %420 = vrot.lane.b32.xlu0 %v1286_v4, %s1202_s16  ;;  %v484_v28 = vld [vmem:[%s1519_s5 + $0x28] sm:$0xff]  ;;  %v479_v31 = vld [vmem:[%s1519_s5] sm:$0xff]  ;;  %v403_v32 = vld [vmem:[%s377_s11 + $0x10] sm:$0xff] }
  0x15   : > { %v401_v34 = vld [vmem:[%s377_s11] sm:$0xff]  ;;  %v402_v35 = vld [vmem:[%s377_s11 + $0x8] sm:$0xff]  ;;  %v803_v41 = vld [vmem:[%s1521_s7 + $0x10] sm:$0xff]  ;;  %s385_s11 = scalar_lea.vmem %s1522_s8, %s1269_s9 }
  0x16   : > { %v480_v36 = vld [vmem:[%s1519_s5 + $0x8] sm:$0xff]  ;;  %v801_v38 = vld [vmem:[%s1521_s7] sm:$0xff]  ;;  %v455_v39 = vpack.c.bf16 %v402_v35, %v401_v34  ;;  %v804_v44 = vld [vmem:[%s1521_s7 + $0x18] sm:$0xff] }
  0x17   : > { %444 = vrot.lane.b32.xlu1 %v1303_v12, %s1202_s16  ;;  %v802_v40 = vld [vmem:[%s1521_s7 + $0x8] sm:$0xff]  ;;  %v395_v50 = vld [vmem:[%s1391_s10 + $0x10] sm:$0xff]  ;;  %v393_v52 = vld [vmem:[%s1391_s10] sm:$0xff] }
  0x18   : > { %1140 = vrot.lane.b32.xlu0 %v1139_v13, %s1202_s16  ;;  %v394_v49 = vld [vmem:[%s1391_s10 + $0x8] sm:$0xff]  ;;  %v450_v53 = vpack.c.bf16 %v393_v52, %v1286_v4  ;;  %v1041_v62 = vld [vmem:[%s1391_s10 + $0x13] sm:$0xff] }
  0x19   : > { %v451_v51 = vpack.c.bf16 %v395_v50, %v394_v49  ;;  %v1040_v61 = vld [vmem:[%s1391_s10 + $0xb] sm:$0xff]  ;;  %v1154_v10 = vld [vmem:[%s1518_s4 + $0x14] ss:$8 sps:$4 sm:$0xff]  }
  0x1a   : > { %v460_v63 = vpack.c.bf16 %v1041_v62, %v1040_v61  ;;  %v1151_v9 = vld [vmem:[%s1518_s4] ss:$8 sps:$4 sm:$0xff]   ;;  %v1160_v8 = vld [vmem:[%s1518_s4 + $0x34] ss:$8 sps:$4 sm:$0xff]   ;;  %v1163_v13 = vld [vmem:[%s1518_s4 + $0x44] ss:$8 sps:$4 sm:$0xff]  }
  0x1b   : > { %1145 = vrot.lane.b32.xlu1 %v1144_v14, %s1202_s16  ;;  %v1159_v7 = vld [vmem:[%s1518_s4 + $0x20] ss:$8 sps:$4 sm:$0xff]   ;;  %v1168_v16 = vld [vmem:[%s1518_s4 + $0x50] ss:$8 sps:$4 sm:$0xff]  }
  0x1c   : > { %567 = vperm.xlu0 %1149, %v493_v18   ;;  %v1165_v14 = vld [vmem:[%s1518_s4 + $0x40] ss:$8 sps:$4 sm:$0xff]  }
  0x1d   : > { %v1171_v18 = vld [vmem:[%s1518_s4 + $0x60] ss:$8 sps:$4 sm:$0xff]  }
  0x1f   : > { %572 = vperm.xlu1 %1150, %v494_v17   ;;  %v1169_v17 = vld [vmem:[%s1518_s4 + $0x64] ss:$8 sps:$4 sm:$0xff]  }
  0x20   : > { %562 = vperm.xlu0 %1149, %v492_v20   ;;  %v1174_v20 = vld [vmem:[%s1518_s4 + $0x70] ss:$8 sps:$4 sm:$0xff]  }
  0x23   : > { %557 = vperm.xlu1 %1150, %v491_v19   ;;  %v1172_v19 = vld [vmem:[%s1518_s4 + $0x74] ss:$8 sps:$4 sm:$0xff]  }
  0x24   : > { %552 = vperm.xlu0 %1149, %v490_v22  }
  0x27   : > { %547 = vperm.xlu1 %1150, %v489_v21  }
  0x28   : > { %542 = vperm.xlu0 %1149, %v488_v24  }
  0x2b   : > { %537 = vperm.xlu1 %1150, %v487_v23  }
  0x2c   : > { %532 = vperm.xlu0 %1149, %v486_v26  }
  0x2f   : > { %527 = vperm.xlu1 %1150, %v485_v25   ;;  %v1175_v25 = vld [vmem:[%s1520_s6] sm:$0xff]  }
  0x30   : > { %522 = vperm.xlu0 %1149, %v484_v28   ;;  %1104 = vmatprep.mubr.bf16.mxu1 %v1175_v25 }
  0x33   : > { %517 = vperm.xlu1 %1150, %v483_v27  }
  0x34   : > { %512 = vperm.xlu0 %1149, %v482_v30  }
  0x37   : > { %507 = vperm.xlu1 %1150, %v481_v29  }
  0x38   : > { %502 = vperm.xlu0 %1149, %v480_v36  }
  0x3b   : > { %497 = vperm.xlu1 %1150, %v479_v31  }
  0x3c   : > { %812 = vperm.xlu0 %1149, %v802_v40  }
  0x3f   : > { %807 = vperm.xlu1 %1150, %v801_v38  }
  0x40   : > { %822 = vperm.xlu0 %1149, %v804_v44  }
  0x43   : > { %817 = vperm.xlu1 %1150, %v803_v41  }
  0x82   : > { %v429_v33 = vpop.permute.xlu0 %428 }
  0x83   : > { %v456_v37 = vpack.c.bf16 %v429_v33, %v403_v32 }
  0x85   : > { %677 = vmatpush1.bf16.msra.mxu0 %v456_v37  ;;  %v1136_v43 = vpop.permute.xlu1 %1135 }
  0x86   : > { %678 = vmatprep.subr.bf16.mxu0 %v1201_v0  ;;  %v421_v42 = vpop.permute.xlu0 %420  ;;  %v1138_v46 = vunpack.i.h.bf16 %v1136_v43  ;;  %v1137_v47 = vunpack.i.l.bf16 %v1136_v43 }
  0x87   : > { %v453_v45 = vpack.c.bf16 %v1279_v1, %v421_v42  ;;  %v1039_v1 = vld [vmem:[%s1391_s10 + $0x3] sm:$0xff] }
  0x88   : > { %v452_v48 = vpack.c.bf16 %v1138_v46, %v1137_v47  ;;  %v459_v4 = vpack.c.bf16 %v1039_v1, %v1303_v12  ;;  %v1162_v12 = vld [vmem:[%s1518_s4 + $0x30] ss:$8 sps:$4 sm:$0xff]  }
  0x89   : > { %679 = vmatpush1.bf16.msra.mxu0 %v455_v39  ;;  %v445_v54 = vpop.permute.xlu1 %444 }
  0x8a   : > { %680 = vmatprep.subr.bf16.mxu0 %v1201_v0  ;;  %v462_v55 = vpack.c.bf16 %v445_v54, %v445_v54  ;;  %v1141_v56 = vpop.permute.xlu0 %1140 }
  0x8b   : > { %v1143_v57 = vunpack.i.h.bf16 %v1141_v56  ;;  %v1142_v58 = vunpack.i.l.bf16 %v1141_v56 }
  0x8c   : > { %v674_v59 = vsel %vm672_vm1, %v462_v55, 0 }
  0x8d   : > { %681 = vmatpush1.bf16.msra.mxu0 %v454_v11  ;;  %v461_v60 = vpack.c.bf16 %v1143_v57, %v1142_v58  ;;  %v1146_v2 = vpop.permute.xlu1 %1145  ;;  %v1156_v11 = vld [vmem:[%s1518_s4 + $0x10] ss:$8 sps:$4 sm:$0xff]  }
  0x8e   : > { %682 = vmatprep.subr.bf16.mxu0 %v1201_v0  ;;  %v1148_v3 = vunpack.i.h.bf16 %v1146_v2  ;;  %v1147_v5 = vunpack.i.l.bf16 %v1146_v2 }
  0x91   : > { %683 = vmatpush1.bf16.msra.mxu0 %v453_v45 }
  0x92   : > { %684 = vmatprep.subr.bf16.mxu0 %v1201_v0 }
  0x95   : > { %685 = vmatpush1.bf16.msra.mxu0 %v452_v48 }
  0x96   : > { %686 = vmatprep.subr.bf16.mxu0 %v1201_v0 }
  0x97   : > { %v568_v22 = vpop.permute.xlu0 %567 }
  0x99   : > { %687 = vmatpush1.bf16.msra.mxu0 %v451_v51 }
  0x9a   : > { %688 = vmatprep.subr.bf16.mxu0 %v1201_v0  ;;  %v573_v21 = vpop.permute.xlu1 %572 }
  0x9b   : > { %v563_v24 = vpop.permute.xlu0 %562 }
  0x9d   : > { %689 = vmatpush1.bf16.msra.mxu0 %v450_v53 }
  0x9e   : > { %690 = vmatprep.subr.bf16.mxu0 %v1201_v0  ;;  %v558_v23 = vpop.permute.xlu1 %557 }
  0x9f   : > { %v553_v27 = vpop.permute.xlu0 %552 }
  0xa1   : > { %691 = vmatpush1.bf16.msra.mxu0 %v449_v6  ;;  %v457_v6 = vpack.c.bf16 %v1148_v3, %v1147_v5 }
  0xa2   : > { %696 = vmatprep.subr.bf16.mxu0 %v1201_v0  ;;  %v1472_v26 = vpop.permute.xlu1 %547 }
  0xa3   : > { %v543_v29 = vpop.permute.xlu0 %542 }
  0xa5   : > { %697 = vmatpush2.bf16.msra.mxu0 %v674_v59 }
  0xa6   : > { %698 = vmatprep.subr.bf16.mxu0 %v1201_v0  ;;  %v1474_v28 = vpop.permute.xlu1 %537 }
  0xa7   : > { %v1478_v31 = vpop.permute.xlu0 %532 }
  0xa9   : > { %699 = vmatpush2.bf16.msra.mxu0 %v461_v60 }
  0xaa   : > { %700 = vmatprep.subr.bf16.mxu0 %v1201_v0  ;;  %v1476_v30 = vpop.permute.xlu1 %527 }
  0xab   : > { %v1482_v33 = vpop.permute.xlu0 %522 }
  0xad   : > { %701 = vmatpush2.bf16.msra.mxu0 %v460_v63 }
  0xae   : > { %702 = vmatprep.subr.bf16.mxu0 %v1201_v0  ;;  %v1480_v32 = vpop.permute.xlu1 %517 }
  0xaf   : > { %v513_v35 = vpop.permute.xlu0 %512 }
  0xb1   : > { %703 = vmatpush2.bf16.msra.mxu0 %v459_v4 }
  0xb2   : > { %704 = vmatprep.subr.bf16.mxu0 %v1201_v0  ;;  %v508_v34 = vpop.permute.xlu1 %507 }
  0xb3   : > { %v503_v39 = vpop.permute.xlu0 %502 }
  0xb5   : > { %705 = vmatpush2.bf16.msra.mxu0 %v458_v15  ;;  %v1166_v15 = vld [vmem:[%s1518_s4 + $0x54] ss:$8 sps:$4 sm:$0xff]  }
  0xb6   : > { %706 = vmatprep.subr.bf16.mxu0 %v1201_v0  ;;  %v1157_v0 = vld [vmem:[%s1518_s4 + $0x24] ss:$8 sps:$4 sm:$0xff]   ;;  %v498_v36 = vpop.permute.xlu1 %497 }
  0xb9   : > { %707 = vmatpush2.bf16.msra.mxu0 %v457_v6 }
  0xbc   : > { %709 = vmatmul.mubr.bf16.vlgmr.msra.gmra.mxu0 %v1151_v9 }
  0xbd   : > { %1059 = vmatprep.mubr.msk.bf16.mxu0 %vm647_vm0, %v1154_v10 }
  0xc4   : > { %717 = vmatmul.mubr.bf16.gmra.mxu0 %v1156_v11 }
  0xc5   : > { %1060 = vmatprep.mubr.msk.bf16.mxu0 %vm647_vm0, %v1157_v0 }
  0xcc   : > { %725 = vmatmul.mubr.bf16.gmra.mxu0 %v1159_v7 }
  0xcd   : > { %1061 = vmatprep.mubr.msk.bf16.mxu0 %vm647_vm0, %v1160_v8 }
  0xd4   : > { %733 = vmatmul.mubr.bf16.gmra.mxu0 %v1162_v12 }
  0xd5   : > { %1062 = vmatprep.mubr.msk.bf16.mxu0 %vm647_vm0, %v1163_v13 }
  0xdc   : > { %741 = vmatmul.mubr.bf16.gmra.mxu0 %v1165_v14 }
  0xdd   : > { %1063 = vmatprep.mubr.msk.bf16.mxu0 %vm647_vm0, %v1166_v15 }
  0xe4   : > { %749 = vmatmul.mubr.bf16.gmra.mxu0 %v1168_v16 }
  0xe5   : > { %1064 = vmatprep.mubr.msk.bf16.mxu0 %vm647_vm0, %v1169_v17 }
  0xec   : > { %757 = vmatmul.mubr.bf16.gmra.mxu0 %v1171_v18 }
  0xed   : > { %1065 = vmatprep.mubr.msk.bf16.mxu0 %vm647_vm0, %v1172_v19 }
  0xf4   : > { %765 = vmatmul.mubr.bf16.gmra.mxu0 %v1174_v20 }
 0x17c   : > { %v710_v37 = vpop.f32.mrf.mxu0 }
 0x17d   : > { %v711_v40 = vadd.f32 %v710_v37, %v498_v36 }
 0x17e   : > { %v712_v38 = vpop.f32.mrf.mxu0 }
 0x17f   : > { %v773_v44 = vmax.f32 %v711_v40, 0.0 }
 0x180   : > { %v713_v41 = vpop.f32.mrf.mxu0 }
 0x181   : > { %v714_v42 = vadd.f32 %v713_v41, %v503_v39 }
 0x182   : > { %v715_v43 = vpop.f32.mrf.mxu0 }
 0x183   : > { %v774_v45 = vmax.f32 %v714_v42, 0.0 }
 0x184   : > { %v718_v46 = vpop.f32.mrf.mxu0 }
 0x185   : > { %v1484_v47 = vpack.c.bf16 %v774_v45, %v773_v44  ;;  %v719_v49 = vadd.f32 %v718_v46, %v508_v34 }
 0x186   : > { %v720_v48 = vpop.f32.mrf.mxu0 }
 0x187   : > { %v775_v53 = vmax.f32 %v719_v49, 0.0 }
 0x188   : > { %v721_v50 = vpop.f32.mrf.mxu0 }
 0x189   : > { %v722_v51 = vadd.f32 %v721_v50, %v513_v35 }
 0x18a   : > { %v723_v52 = vpop.f32.mrf.mxu0 }
 0x18b   : > { %v776_v54 = vmax.f32 %v722_v51, 0.0 }
 0x18c   : > { %v726_v55 = vpop.f32.mrf.mxu0 }
 0x18d   : > { %v1486_v56 = vpack.c.bf16 %v776_v54, %v775_v53  ;;  %v727_v45 = vadd.f32 %v726_v55, %v1480_v32  ;;  %v808_v32 = vpop.permute.xlu1 %807 }
 0x18e   : > { %v728_v57 = vpop.f32.mrf.mxu0 }
 0x190   : > { %v729_v58 = vpop.f32.mrf.mxu0 }
 0x191   : > { %v818_v50 = vpop.permute.xlu1 %817 }
 0x192   : > { %v731_v59 = vpop.f32.mrf.mxu0 }
 0x194   : > { %v734_v60 = vpop.f32.mrf.mxu0 }
 0x195   : > { %v735_v42 = vadd.f32 %v734_v60, %v1476_v30  ;;  %v1176_v30 = vld [vmem:[%s1520_s6 + $0x8] sm:$0xff]  }
 0x196   : > { %v736_v61 = vpop.f32.mrf.mxu0 }
 0x197   : > { %v779_v46 = vmax.f32 %v735_v42, 0.0 }
 0x198   : > { %v737_v62 = vpop.f32.mrf.mxu0 }
 0x19a   : > { %v739_v63 = vpop.f32.mrf.mxu0 }
 0x19c   : > { %v742_v1 = vpop.f32.mrf.mxu0 }
 0x19e   : > { %v744_v4 = vpop.f32.mrf.mxu0 }
 0x1a0   : > { %v745_v2 = vpop.f32.mrf.mxu0 }
 0x1a1   : > { %v746_v39 = vadd.f32 %v745_v2, %v543_v29 }
 0x1a2   : > { %v747_v3 = vpop.f32.mrf.mxu0 }
 0x1a4   : > { %v750_v5 = vpop.f32.mrf.mxu0 }
 0x1a5   : > { %v751_v36 = vadd.f32 %v750_v5, %v1472_v26  ;;  %v730_v26 = vadd.f32 %v729_v58, %v1482_v33  ;;  %v813_v33 = vpop.permute.xlu0 %812 }
 0x1a6   : > { %v752_v6 = vpop.f32.mrf.mxu0 }
 0x1a8   : > { %v753_v9 = vpop.f32.mrf.mxu0 }
 0x1a9   : > { %v754_v20 = vadd.f32 %v753_v9, %v553_v27  ;;  %v823_v55 = vpop.permute.xlu0 %822 }
 0x1aa   : > { %v755_v10 = vpop.f32.mrf.mxu0 }
 0x1ab   : > { %v784_v40 = vmax.f32 %v754_v20, 0.0 }
 0x1ac   : > { %v758_v11 = vpop.f32.mrf.mxu0 }
 0x1ad   : > { %v759_v17 = vadd.f32 %v758_v11, %v558_v23  ;;  %v782_v23 = vmax.f32 %v746_v39, 0.0 }
 0x1ae   : > { %v760_v0 = vpop.f32.mrf.mxu0 }
 0x1af   : > { %v785_v37 = vmax.f32 %v759_v17, 0.0 }
 0x1b0   : > { %v761_v7 = vpop.f32.mrf.mxu0 }
 0x1b1   : > { %v762_v14 = vadd.f32 %v761_v7, %v563_v24  ;;  %v743_v24 = vadd.f32 %v742_v1, %v1474_v28  ;;  %v778_v28 = vmax.f32 %v730_v26, 0.0 }
 0x1b2   : > { %v763_v8 = vpop.f32.mrf.mxu0 }
 0x1b3   : > { %v786_v25 = vmax.f32 %v762_v14, 0.0  ;;  %v781_v43 = vmax.f32 %v743_v24, 0.0 }
 0x1b4   : > { %v766_v12 = vpop.f32.mrf.mxu0 }
 0x1b5   : > { %v767_v15 = vadd.f32 %v766_v12, %v568_v22  ;;  %v795_v41 = vpack.c.bf16 %v786_v25, %v785_v37  ;;  %v783_v22 = vmax.f32 %v751_v36, 0.0  ;;  %v793_v44 = vpack.c.bf16 %v782_v23, %v781_v43 }
 0x1b6   : > { %v768_v13 = vpop.f32.mrf.mxu0 }
 0x1b7   : > { %v787_v34 = vmax.f32 %v767_v15, 0.0  ;;  %v794_v27 = vpack.c.bf16 %v784_v40, %v783_v22 }
 0x1b8   : > { %v769_v16 = vpop.f32.mrf.mxu0 }
 0x1b9   : > { %v770_v18 = vadd.f32 %v769_v16, %v573_v21  ;;  %v738_v21 = vadd.f32 %v737_v62, %v1478_v31  ;;  %v777_v31 = vmax.f32 %v727_v45, 0.0 }
 0x1ba   : > { %v771_v19 = vpop.f32.mrf.mxu0 }
 0x1bb   : > { %v788_v35 = vmax.f32 %v770_v18, 0.0  ;;  %v780_v29 = vmax.f32 %v738_v21, 0.0  ;;  %v791_v49 = vpack.c.bf16 %v778_v28, %v777_v31 }
 0x1bd   : > { %v796_v38 = vpack.c.bf16 %v788_v35, %v787_v34  ;;  %v792_v48 = vpack.c.bf16 %v780_v29, %v779_v46 }
 0x1bf   : > { %1088 = vmatprep.subr.bf16.mxu1 %v796_v38 }
 0x1c0   : > { %1089 = vmatpush3.bf16.msra.mxu1 %v796_v38 }
 0x1c1   : > { %1090 = vmatprep.subr.bf16.mxu1 %v795_v41 }
 0x1c4   : > { %1091 = vmatpush3.bf16.msra.mxu1 %v795_v41 }
 0x1c5   : > { %1092 = vmatprep.subr.bf16.mxu1 %v794_v27 }
 0x1c8   : > { %1093 = vmatpush3.bf16.msra.mxu1 %v794_v27 }
 0x1c9   : > { %1094 = vmatprep.subr.bf16.mxu1 %v793_v44 }
 0x1cc   : > { %1095 = vmatpush3.bf16.msra.mxu1 %v793_v44 }
 0x1cd   : > { %1096 = vmatprep.subr.bf16.mxu1 %v792_v48 }
 0x1d0   : > { %1097 = vmatpush3.bf16.msra.mxu1 %v792_v48 }
 0x1d1   : > { %1098 = vmatprep.subr.bf16.mxu1 %v791_v49 }
 0x1d4   : > { %1099 = vmatpush3.bf16.msra.mxu1 %v791_v49 }
 0x1d5   : > { %1100 = vmatprep.subr.bf16.mxu1 %v1486_v56 }
 0x1d8   : > { %1101 = vmatpush3.bf16.msra.mxu1 %v1486_v56 }
 0x1d9   : > { %1102 = vmatprep.subr.bf16.mxu1 %v1484_v47 }
 0x1dc   : > { %1103 = vmatpush3.bf16.msra.mxu1 %v1484_v47 }
 0x1df   : > { %1105 = vmatmul.mubr.bf16.vlgmr.msra.gmra.mxu1 %v1176_v30 }
 0x29f   : > { %v1106_v51 = vpop.f32.mrf.mxu1 }
 0x2a0   : > { %v880_v52 = vadd.f32 %v1106_v51, %v818_v50 }
 0x2a1   : > { %v871_v53 = vpop.f32.mrf.mxu1 }
 0x2a2   : > { %1069 = vst.msk [vmem:[%s385_s11 + $0x10] sm:$0xff] %vm886_vm2, %v880_v52  ;;  %v872_v54 = vadd.f32 %v871_v53, %v808_v32 }
 0x2a3   : > { %v1107_v56 = vpop.f32.mrf.mxu1 }
 0x2a4   : > { %887 = vst.msk [vmem:[%s385_s11] sm:$0xff] %vm886_vm2, %v872_v54  ;;  %v883_v57 = vadd.f32 %v1107_v56, %v823_v55 }
 0x2a5   : > { %v874_v58 = vpop.f32.mrf.mxu1 }
 0x2a6   : > { %1070 = vst.msk [vmem:[%s385_s11 + $0x18] sm:$0xff] %vm886_vm2, %v883_v57  ;;  %v875_v47 = vadd.f32 %v874_v58, %v813_v33 }
 0x2a8   : > { %1068 = vst.msk [vmem:[%s385_s11 + $0x8] sm:$0xff] %vm886_vm2, %v875_v47 }
 0x2a9 PF: > { %s18_s29 = sadd.s32 1, %s1199_s29   ;;  %s1523_s27 = smov %s1195_s28 }
 0x2aa   : > { %p15_p5 = scmp.ge.s32.totalorder %s18_s29, 4   ;;  %s1524_s28 = smov %s1526_s30 }
 0x2ac   :  { %17 = sbr.rel (!%p15_p5) target bundleno = 2 (0x2), region = 100 }

</bundles_post_ra>
